<compile_context>
chip_gen: v7x
topology: tpu7x:2x2x1
jax: 0.10.0
libtpu: 0.0.40
codegen_flags: <defaults>
</compile_context>

<pallas_src>
import functools

import jax
import jax.numpy as jnp
from jax.experimental import pallas as pl
from jax.experimental.pallas import tpu as pltpu

EPS = 1e-5
LANE = 128


# ----------------------------- Pallas kernels ------------------------------
def _conv_bn_relu_kernel(p_ref, w_ref, b_ref, o_ref):
    # conv1 (matmul on im2col patches, BN scale pre-folded into w) + bias + ReLU
    acc = jnp.dot(p_ref[...], w_ref[...], preferred_element_type=jnp.float32)
    o_ref[...] = jnp.maximum(acc + b_ref[...], 0.0)


def _conv_bn_add_relu_kernel(p_ref, w_ref, b_ref, sc_ref, o_ref):
    # conv2 (matmul, BN scale pre-folded) + bias + shortcut add + ReLU
    acc = jnp.dot(p_ref[...], w_ref[...], preferred_element_type=jnp.float32)
    o_ref[...] = jnp.maximum(acc + b_ref[...] + sc_ref[...], 0.0)


def _run_conv_bn(kernel, patches, w_mat, bias, shortcut, m_pad, c_pad, tm):
    k = patches.shape[1]
    grid = (m_pad // tm,)

    in_specs = [
        pl.BlockSpec((tm, k), lambda i: (i, 0)),                 # patch tile
        pl.BlockSpec((w_mat.shape[0], c_pad), lambda i: (0, 0)), # weights (resident)
        pl.BlockSpec((1, c_pad), lambda i: (0, 0)),              # bias (resident)
    ]
    args = [patches, w_mat, bias]
    if shortcut is not None:
        in_specs.append(pl.BlockSpec((tm, c_pad), lambda i: (i, 0)))
        args.append(shortcut)

    flops = 2 * m_pad * k * c_pad
    bytes_accessed = sum(int(a.size) * a.dtype.itemsize for a in args)
    bytes_accessed += m_pad * c_pad * 4  # output

    return pl.pallas_call(
        kernel,
        out_shape=jax.ShapeDtypeStruct((m_pad, c_pad), jnp.float32),
        grid=grid,
        in_specs=in_specs,
        out_specs=pl.BlockSpec((tm, c_pad), lambda i: (i, 0)),
        compiler_params=pltpu.CompilerParams(
            dimension_semantics=("parallel",),
            vmem_limit_bytes=32 * 1024 * 1024,  # safe on v5e/v6e/v7x
        ),
        cost_estimate=pl.CostEstimate(
            flops=flops, transcendentals=0, bytes_accessed=bytes_accessed),
    )(*args)


# ------------------------------- JAX glue ----------------------------------
def _round_up(x, m):
    return (x + m - 1) // m * m


def _choose_tm(m_rows):
    # Biggest row tile that still gives >=2 grid steps (pipelining / 2 TCs),
    # capped at 1024 so double-buffered tiles comfortably fit v7x's 64 MiB VMEM.
    for tm in (1024, 512, 256, 128, 64):
        if m_rows >= 2 * tm:
            return tm
    return 64


def _pad2d(a, rows, cols):
    return jnp.pad(a, ((0, rows - a.shape[0]), (0, cols - a.shape[1])))


def _im2col(x_nhwc, ksize=3, stride=1, pad=1):
    n, h, w, c = x_nhwc.shape
    xp = jnp.pad(x_nhwc, ((0, 0), (pad, pad), (pad, pad), (0, 0)))
    ho = (h + 2 * pad - ksize) // stride + 1
    wo = (w + 2 * pad - ksize) // stride + 1
    cols = []
    for kh in range(ksize):
        for kw in range(ksize):
            cols.append(xp[:, kh:kh + ho * stride:stride,
                           kw:kw + wo * stride:stride, :])
    patches = jnp.concatenate(cols, axis=-1)              # (N, Ho, Wo, 9*C)
    return patches.reshape(n * ho * wo, ksize * ksize * c), (n, ho, wo)


def _fold_bn_into_weight(w_oihw, gamma, beta, mean, var, c_pad):
    # (Cout, Cin, KH, KW) -> (KH*KW*Cin, Cout_pad) with BN scale folded into the
    # columns; returns bf16 weight matrix and f32 bias row.
    c_out = w_oihw.shape[0]
    scale = gamma / jnp.sqrt(var + EPS)
    bias = beta - mean * scale
    w_mat = jnp.transpose(w_oihw, (2, 3, 1, 0)).reshape(-1, c_out)
    w_mat = w_mat * scale[None, :]
    w_mat = jnp.pad(w_mat, ((0, 0), (0, c_pad - c_out))).astype(jnp.bfloat16)
    bias = jnp.pad(bias, (0, c_pad - c_out)).reshape(1, c_pad).astype(jnp.float32)
    return w_mat, bias


@functools.partial(jax.jit, static_argnames=("stride", "planes"))
def basic_block_a(x_nchw, params, *, stride, planes):
    w1, g1, b1, m1, v1, w2, g2, b2, m2, v2 = params
    in_planes = x_nchw.shape[1]

    x_nhwc = jnp.transpose(x_nchw, (0, 2, 3, 1)).astype(jnp.float32)

    # ---- conv1 + bn1 + relu ----
    p1, (n, ho, wo) = _im2col(x_nhwc, stride=stride)
    m = n * ho * wo
    c_pad = _round_up(planes, LANE)
    tm = _choose_tm(m)
    m_pad = _round_up(m, tm)

    w1m, bias1 = _fold_bn_into_weight(w1, g1, b1, m1, v1, c_pad)
    p1p = _pad2d(p1, m_pad, p1.shape[1]).astype(jnp.bfloat16)
    out1 = _run_conv_bn(_conv_bn_relu_kernel, p1p, w1m, bias1, None,
                        m_pad, c_pad, tm)
    out1_nhwc = out1[:m, :planes].reshape(n, ho, wo, planes)

    # ---- shortcut (option A): x[:, :, ::2, ::2] + zero channel pad ----
    if stride != 1 or in_planes != planes:
        pad_c = planes // 4
        assert in_planes + 2 * pad_c == planes, (
            "option-A shortcut requires in_planes + 2*(planes//4) == planes")
        sc = x_nhwc[:, ::2, ::2, :]
        sc = jnp.pad(sc, ((0, 0), (0, 0), (0, 0), (pad_c, pad_c)))
    else:
        sc = x_nhwc
    sc_mat = _pad2d(sc.reshape(m, planes), m_pad, c_pad)   # f32

    # ---- conv2 + bn2 + shortcut add + relu ----
    # TODO(synk): keep out1 in VMEM (fused two-conv kernel) instead of the
    #             HBM round trip + second XLA im2col.
    p2, _ = _im2col(out1_nhwc, stride=1)
    w2m, bias2 = _fold_bn_into_weight(w2, g2, b2, m2, v2, c_pad)
    p2p = _pad2d(p2, m_pad, p2.shape[1]).astype(jnp.bfloat16)
    out2 = _run_conv_bn(_conv_bn_add_relu_kernel, p2p, w2m, bias2, sc_mat,
                        m_pad, c_pad, tm)

    out_nhwc = out2[:m, :planes].reshape(n, ho, wo, planes)
    return jnp.transpose(out_nhwc, (0, 3, 1, 2))           # back to NCHW


# --------------------------- reference (plain JAX) --------------------------
def _reference(x, params, stride, planes):
    w1, g1, b1, m1, v1, w2, g2, b2, m2, v2 = params

    def conv(xx, ww, s):
        return jax.lax.conv_general_dilated(
            xx, ww, (s, s), ((1, 1), (1, 1)),
            dimension_numbers=("NCHW", "OIHW", "NCHW"))

    def bn(xx, g, b, m, v):
        sh = (1, -1, 1, 1)
        return ((xx - m.reshape(sh)) / jnp.sqrt(v.reshape(sh) + EPS)
                * g.reshape(sh) + b.reshape(sh))

    out = jax.nn.relu(bn(conv(x, w1, stride), g1, b1, m1, v1))
    out = bn(conv(out, w2, 1), g2, b2, m2, v2)
    pad_c = planes // 4
    sc = jnp.pad(x[:, :, ::2, ::2], ((0, 0), (pad_c, pad_c), (0, 0), (0, 0)))
    return jax.nn.relu(out + sc)


# --------------------------------- main -------------------------------------
if __name__ == "__main__":
    in_planes, planes, stride = 4, 8, 2
    N, H, W = 2, 16, 16

    key = jax.random.PRNGKey(0)
    ks = jax.random.split(key, 11)
    x = jax.random.normal(ks[0], (N, in_planes, H, W), jnp.float32)

    # Deterministic parameter init (BatchNorm in eval semantics, folded).
    w1 = 0.1 * jax.random.normal(ks[1], (planes, in_planes, 3, 3), jnp.float32)
    g1 = jax.random.uniform(ks[2], (planes,), jnp.float32, 0.5, 1.5)
    b1 = 0.1 * jax.random.normal(ks[3], (planes,), jnp.float32)
    m1 = 0.1 * jax.random.normal(ks[4], (planes,), jnp.float32)
    v1 = jax.random.uniform(ks[5], (planes,), jnp.float32, 0.5, 1.5)

    w2 = 0.1 * jax.random.normal(ks[6], (planes, planes, 3, 3), jnp.float32)
    g2 = jax.random.uniform(ks[7], (planes,), jnp.float32, 0.5, 1.5)
    b2 = 0.1 * jax.random.normal(ks[8], (planes,), jnp.float32)
    m2 = 0.1 * jax.random.normal(ks[9], (planes,), jnp.float32)
    v2 = jax.random.uniform(ks[10], (planes,), jnp.float32, 0.5, 1.5)

    params = (w1, g1, b1, m1, v1, w2, g2, b2, m2, v2)

    out = basic_block_a(x, params, stride=stride, planes=planes)
    out = jax.block_until_ready(out)

    ref = _reference(x, params, stride, planes)
    assert out.shape == (N, planes, H // stride, W // stride), out.shape
    # bf16 patch/weight inputs (f32 accumulate) => looser tolerance than pure f32.
    max_err = float(jnp.max(jnp.abs(out - ref)))
    mean_err = float(jnp.mean(jnp.abs(out - ref)))
    assert max_err < 1e-1, max_err
    assert mean_err < 1e-2, mean_err

    print("KERNEL_OK")
</pallas_src>

<mosaic_0001>
module attributes {stable_mosaic.version = 11 : i64} {
  func.func @_conv_bn_relu_kernel(%arg0: i32, %arg1: memref<64x36xbf16, #tpu.memory_space<vmem>>, %arg2: memref<36x128xbf16, #tpu.memory_space<vmem>>, %arg3: memref<1x128xf32, #tpu.memory_space<vmem>>, %arg4: memref<64x128xf32, #tpu.memory_space<vmem>>) attributes {dimension_semantics = [#tpu.dimension_semantics<parallel>], iteration_bounds = array<i64: 2>, scalar_prefetch = 0 : i64, scratch_operands = 0 : i64, tpu.core_type = #tpu.core_type<tc>, window_params = [{transform_indices = @transform_0, window_bounds = array<i64: 64, 36>}, {pipeline_mode = #tpu.pipeline_mode<synchronous>, transform_indices = @transform_1, window_bounds = array<i64: 36, 128>}, {pipeline_mode = #tpu.pipeline_mode<synchronous>, transform_indices = @transform_2, window_bounds = array<i64: 1, 128>}, {transform_indices = @transform_3, window_bounds = array<i64: 64, 128>}]} {
    %c0 = arith.constant 0 : index
    %c0_0 = arith.constant 0 : index
    %0 = vector.load %arg1[%c0, %c0_0] : memref<64x36xbf16, #tpu.memory_space<vmem>>, vector<64x36xbf16>
    %c0_1 = arith.constant 0 : index
    %c0_2 = arith.constant 0 : index
    %1 = vector.load %arg2[%c0_1, %c0_2] : memref<36x128xbf16, #tpu.memory_space<vmem>>, vector<36x128xbf16>
    %cst = arith.constant dense<0.000000e+00> : vector<64x128xf32>
    %2 = tpu.matmul %0, %1, %cst {dimension_numbers = #tpu.dot_dimension_numbers<[1], [0], [0], [1], [0, 0, 1, 1], [], []>} : vector<64x36xbf16>, vector<36x128xbf16>, vector<64x128xf32> -> vector<64x128xf32>
    %c0_3 = arith.constant 0 : index
    %c0_4 = arith.constant 0 : index
    %3 = vector.load %arg3[%c0_3, %c0_4] : memref<1x128xf32, #tpu.memory_space<vmem>>, vector<1x128xf32>
    %4 = vector.broadcast %3 : vector<1x128xf32> to vector<64x128xf32>
    %5 = arith.addf %2, %4 : vector<64x128xf32>
    %cst_5 = arith.constant 0.000000e+00 : f32
    %6 = vector.broadcast %cst_5 : f32 to vector<64x128xf32>
    %7 = arith.maximumf %5, %6 : vector<64x128xf32>
    %c0_6 = arith.constant 0 : index
    %c0_7 = arith.constant 0 : index
    %8 = vector.load %arg4[%c0_6, %c0_7] : memref<64x128xf32, #tpu.memory_space<vmem>>, vector<64x128xf32>
    tpu.vector_store %arg4[%c0_6, %c0_7], %7 {strides = array<i32>} : memref<64x128xf32, #tpu.memory_space<vmem>>, vector<64x128xf32>,
    return
  }
  func.func @transform_0(%arg0: i32) -> (i32, i32) {
    %c0_i32 = arith.constant 0 : i32
    %c0_i32_0 = arith.constant 0 : i32
    return %arg0, %c0_i32 : i32, i32
  }
  func.func @transform_1(%arg0: i32) -> (i32, i32) {
    %c0_i32 = arith.constant 0 : i32
    %c0_i32_0 = arith.constant 0 : i32
    %c0_i32_1 = arith.constant 0 : i32
    return %c0_i32, %c0_i32_0 : i32, i32
  }
  func.func @transform_2(%arg0: i32) -> (i32, i32) {
    %c0_i32 = arith.constant 0 : i32
    %c0_i32_0 = arith.constant 0 : i32
    %c0_i32_1 = arith.constant 0 : i32
    return %c0_i32, %c0_i32_0 : i32, i32
  }
  func.func @transform_3(%arg0: i32) -> (i32, i32) {
    %c0_i32 = arith.constant 0 : i32
    %c0_i32_0 = arith.constant 0 : i32
    return %arg0, %c0_i32 : i32, i32
  }
}

module attributes {stable_mosaic.version = 11 : i64} {
  func.func @_conv_bn_add_relu_kernel(%arg0: i32, %arg1: memref<64x72xbf16, #tpu.memory_space<vmem>>, %arg2: memref<72x128xbf16, #tpu.memory_space<vmem>>, %arg3: memref<1x128xf32, #tpu.memory_space<vmem>>, %arg4: memref<64x128xf32, #tpu.memory_space<vmem>>, %arg5: memref<64x128xf32, #tpu.memory_space<vmem>>) attributes {dimension_semantics = [#tpu.dimension_semantics<parallel>], iteration_bounds = array<i64: 2>, scalar_prefetch = 0 : i64, scratch_operands = 0 : i64, tpu.core_type = #tpu.core_type<tc>, window_params = [{transform_indices = @transform_0, window_bounds = array<i64: 64, 72>}, {pipeline_mode = #tpu.pipeline_mode<synchronous>, transform_indices = @transform_1, window_bounds = array<i64: 72, 128>}, {pipeline_mode = #tpu.pipeline_mode<synchronous>, transform_indices = @transform_2, window_bounds = array<i64: 1, 128>}, {transform_indices = @transform_3, window_bounds = array<i64: 64, 128>}, {transform_indices = @transform_4, window_bounds = array<i64: 64, 128>}]} {
    %c0 = arith.constant 0 : index
    %c0_0 = arith.constant 0 : index
    %0 = vector.load %arg1[%c0, %c0_0] : memref<64x72xbf16, #tpu.memory_space<vmem>>, vector<64x72xbf16>
    %c0_1 = arith.constant 0 : index
    %c0_2 = arith.constant 0 : index
    %1 = vector.load %arg2[%c0_1, %c0_2] : memref<72x128xbf16, #tpu.memory_space<vmem>>, vector<72x128xbf16>
    %cst = arith.constant dense<0.000000e+00> : vector<64x128xf32>
    %2 = tpu.matmul %0, %1, %cst {dimension_numbers = #tpu.dot_dimension_numbers<[1], [0], [0], [1], [0, 0, 1, 1], [], []>} : vector<64x72xbf16>, vector<72x128xbf16>, vector<64x128xf32> -> vector<64x128xf32>
    %c0_3 = arith.constant 0 : index
    %c0_4 = arith.constant 0 : index
    %3 = vector.load %arg3[%c0_3, %c0_4] : memref<1x128xf32, #tpu.memory_space<vmem>>, vector<1x128xf32>
    %4 = vector.broadcast %3 : vector<1x128xf32> to vector<64x128xf32>
    %5 = arith.addf %2, %4 : vector<64x128xf32>
    %c0_5 = arith.constant 0 : index
    %c0_6 = arith.constant 0 : index
    %6 = vector.load %arg4[%c0_5, %c0_6] : memref<64x128xf32, #tpu.memory_space<vmem>>, vector<64x128xf32>
    %7 = arith.addf %5, %6 : vector<64x128xf32>
    %cst_7 = arith.constant 0.000000e+00 : f32
    %8 = vector.broadcast %cst_7 : f32 to vector<64x128xf32>
    %9 = arith.maximumf %7, %8 : vector<64x128xf32>
    %c0_8 = arith.constant 0 : index
    %c0_9 = arith.constant 0 : index
    %10 = vector.load %arg5[%c0_8, %c0_9] : memref<64x128xf32, #tpu.memory_space<vmem>>, vector<64x128xf32>
    tpu.vector_store %arg5[%c0_8, %c0_9], %9 {strides = array<i32>} : memref<64x128xf32, #tpu.memory_space<vmem>>, vector<64x128xf32>,
    return
  }
  func.func @transform_0(%arg0: i32) -> (i32, i32) {
    %c0_i32 = arith.constant 0 : i32
    %c0_i32_0 = arith.constant 0 : i32
    return %arg0, %c0_i32 : i32, i32
  }
  func.func @transform_1(%arg0: i32) -> (i32, i32) {
    %c0_i32 = arith.constant 0 : i32
    %c0_i32_0 = arith.constant 0 : i32
    %c0_i32_1 = arith.constant 0 : i32
    return %c0_i32, %c0_i32_0 : i32, i32
  }
  func.func @transform_2(%arg0: i32) -> (i32, i32) {
    %c0_i32 = arith.constant 0 : i32
    %c0_i32_0 = arith.constant 0 : i32
    %c0_i32_1 = arith.constant 0 : i32
    return %c0_i32, %c0_i32_0 : i32, i32
  }
  func.func @transform_3(%arg0: i32) -> (i32, i32) {
    %c0_i32 = arith.constant 0 : i32
    %c0_i32_0 = arith.constant 0 : i32
    return %arg0, %c0_i32 : i32, i32
  }
  func.func @transform_4(%arg0: i32) -> (i32, i32) {
    %c0_i32 = arith.constant 0 : i32
    %c0_i32_0 = arith.constant 0 : i32
    return %arg0, %c0_i32 : i32, i32
  }
}

</mosaic_0001>

<bundles_post_ra>
// kernel: basic_block_a.2
= control target key start
LH: loop header
LB: loop body
LE: loop exit
PB: predicated region body
PF: predicated region fallthrough
CT: control target
= control target key end

     0   :  { %s479_s12 = smov 0   ;;  %s512_s0 = inlined_call_operand.vmem [shape: bf16[128,36], index: 0, kind: input, shape index: {}]   ;;  %s513_s1 = inlined_call_operand.vmem [shape: bf16[36,128], index: 1, kind: input, shape index: {}]   ;;  %s514_s2 = inlined_call_operand.vmem [shape: f32[1,128], index: 2, kind: input, shape index: {}]   ;;  %s515_s3 = inlined_call_operand.vmem [shape: f32[128,128], index: 3, kind: output, shape index: {}]  }
   0x1 LB: > { %s384_s13 = sadd.s32 4294967295, %s457_s12   ;;  %p388_p0 = scmp.ge.s32.totalorder %s457_s12, 1  ;;  %s457_s12 = sphi %s479_s12, %s13_s12  }
   0x2   : > { %p138_p1 = scmp.lt.s32.totalorder %s457_s12, 3 }
   0x4   : > { %p139_p2 = pnand %p388_p0, %p138_p1 }
   0x5   : > { %v444_v0 = vld [vmem:[%s513_s1] sm:$0xff] (!%p139_p2)   ;;  %v445_v1 = vld [vmem:[%s513_s1 + $0x8] sm:$0xff] (!%p139_p2)   ;;  %s389_s18 = sshll.u32 (!%p139_p2), %s384_s13, 3  ;;  %v446_v2 = vld [vmem:[%s513_s1 + $0x10] ss:$0 sps:$4 sm:$0x33] (!%p139_p2)  }
   0x6   : > { %142 = sbr.rel (%p139_p2) target bundleno = 238 (0xee), region = 32  ;;  %414 = vmatprep.subr.bf16.mxu0 (!%p139_p2), %v444_v0  ;;  %428 = vmatprep.subr.bf16.mxu1 (!%p139_p2), %v444_v0  ;;  %p163_p3 = scmp.lt.s32.totalorder (!%p139_p2), %s389_s18, 15  ;;  %vm243_vm0 = vcmask (!%p139_p2), 1041408   ;;  %vm230_vm1 = vcmask (!%p139_p2), 293888   ;;  %v393_v8 = vld [vmem:[%s514_s2] ss:$0 sm:$0xff] (!%p139_p2) }
   0x7   : > { %415 = vmatpush3.bf16.msra.mxu0 (!%p139_p2), %v444_v0  ;;  %431 = vmatpush3.bf16.msra.mxu1 (!%p139_p2), %v444_v0  ;;  %v245_v3 = vsel (!%p139_p2), %vm243_vm0, %v446_v2, 0 }
   0x8   : > { %416 = vmatprep.subr.bf16.mxu0 (!%p139_p2), %v445_v1  ;;  %429 = vmatprep.subr.bf16.mxu1 (!%p139_p2), %v445_v1 }
   0xb   : > { %417 = vmatpush3.bf16.msra.mxu0 (!%p139_p2), %v445_v1  ;;  %432 = vmatpush3.bf16.msra.mxu1 (!%p139_p2), %v445_v1 }
   0xc   : > { %434 = vmatprep.subr.msk.bf16.mxu0 (!%p139_p2), %vm243_vm0, %v446_v2  ;;  %435 = vmatprep.subr.msk.bf16.mxu1 (!%p139_p2), %vm243_vm0, %v446_v2 }
   0xd   : > { %s517_s18 = smov (!%p163_p3, %s389_s18), 15 }
   0xe   : > { %s390_s21 = sshll.u32 %s517_s18, 2  ;;  %s392_s27 = sshll.u32 %s517_s18, 3 }
   0xf   : > { %s166_s24 = scalar_lea.vmem %s512_s0, %s390_s21  ;;  %419 = vmatpush3.bf16.msra.mxu0 %v245_v3  ;;  %433 = vmatpush3.bf16.msra.mxu1 %v245_v3  ;;  %s172_s30 = scalar_lea.vmem %s515_s3, %s392_s27 }
  0x10   : > { %v447_v4 = vld [vmem:[%s166_s24] sm:$0xff]   ;;  %v448_v5 = vld [vmem:[%s166_s24 + $0x10] sm:$0xff]   ;;  %v449_v6 = vld [vmem:[%s166_s24 + $0x8] sm:$0xff]  }
  0x11   : > { %420 = vmatprep.mubr.msk.bf16.mxu0 %vm230_vm1, %v447_v4  ;;  %v450_v7 = vld [vmem:[%s166_s24 + $0x18] sm:$0xff]   ;;  %424 = vmatprep.mubr.msk.bf16.mxu1 %vm230_vm1, %v448_v5 }
  0x12   : > { %421 = vmatmul.mubr.msk.bf16.vlgmr.msra.gmra.mrb[0].mxu0 %vm230_vm1, %v449_v6  ;;  %425 = vmatmul.mubr.msk.bf16.vlgmr.msra.gmra.mrb[0].mxu1 %vm230_vm1, %v450_v7 }
  0xe5   : > { %v422_v9 = vpop.f32.mrb[0].mxu0  ;;  %v426_v10 = vpop.f32.mrb[0].mxu1 }
  0xe6   : > { %v290_v11 = vadd.f32 %v422_v9, %v393_v8  ;;  %v306_v12 = vadd.f32 %v426_v10, %v393_v8  ;;  %v281_v13 = vpop.f32.mrb[1].mxu0  ;;  %v297_v14 = vpop.f32.mrb[1].mxu1 }
  0xe7   : > { %v282_v15 = vadd.f32 %v393_v8, %v281_v13  ;;  %v298_v16 = vadd.f32 %v393_v8, %v297_v14  ;;  %v423_v17 = vpop.f32.mrb[2].mxu0  ;;  %v427_v18 = vpop.f32.mrb[2].mxu1 }
  0xe8   : > { %v314_v19 = vmax.f32 %v290_v11, 0.0  ;;  %v318_v20 = vmax.f32 %v306_v12, 0.0  ;;  %v293_v21 = vadd.f32 %v423_v17, %v393_v8  ;;  %v309_v22 = vadd.f32 %v427_v18, %v393_v8  ;;  %v284_v23 = vpop.f32.mrb[3].mxu0  ;;  %v300_v24 = vpop.f32.mrb[3].mxu1 }
  0xe9   : > { %v312_v25 = vmax.f32 %v282_v15, 0.0  ;;  %v316_v26 = vmax.f32 %v298_v16, 0.0  ;;  %v285_v27 = vadd.f32 %v393_v8, %v284_v23  ;;  %v301_v28 = vadd.f32 %v393_v8, %v300_v24 }
  0xea   : > { %322 = vst [vmem:[%s172_s30 + $0x10] sm:$0xff] %v314_v19  ;;  %326 = vst [vmem:[%s172_s30 + $0x30] sm:$0xff] %v318_v20  ;;  %v315_v29 = vmax.f32 %v293_v21, 0.0  ;;  %v319_v30 = vmax.f32 %v309_v22, 0.0 }
  0xeb   : > { %320 = vst [vmem:[%s172_s30] sm:$0xff] %v312_v25  ;;  %324 = vst [vmem:[%s172_s30 + $0x20] sm:$0xff] %v316_v26  ;;  %v313_v31 = vmax.f32 %v285_v27, 0.0  ;;  %v317_v32 = vmax.f32 %v301_v28, 0.0 }
  0xec   : > { %323 = vst [vmem:[%s172_s30 + $0x18] sm:$0xff] %v315_v29  ;;  %327 = vst [vmem:[%s172_s30 + $0x38] sm:$0xff] %v319_v30 }
  0xed   : > { %321 = vst [vmem:[%s172_s30 + $0x8] sm:$0xff] %v313_v31  ;;  %325 = vst [vmem:[%s172_s30 + $0x28] sm:$0xff] %v317_v32 }
  0xee PF: > { %s13_s12 = sadd.s32 1, %s457_s12  }
  0xef   : > { %p10_p4 = scmp.ge.s32.totalorder %s13_s12, 4  }
  0xf1   :  { %12 = sbr.rel (!%p10_p4) target bundleno = 1 (0x1), region = 62 }

// kernel: basic_block_a.3
= control target key start
LH: loop header
LB: loop body
LE: loop exit
PB: predicated region body
PF: predicated region fallthrough
CT: control target
= control target key end

     0   :  { %s593_s15 = smov 0   ;;  %s639_s0 = inlined_call_operand.vmem [shape: bf16[128,72], index: 0, kind: input, shape index: {}]   ;;  %s640_s1 = inlined_call_operand.vmem [shape: bf16[72,128], index: 1, kind: input, shape index: {}]   ;;  %s641_s2 = inlined_call_operand.vmem [shape: f32[1,128], index: 2, kind: input, shape index: {}]   ;;  %s642_s3 = inlined_call_operand.vmem [shape: f32[128,128], index: 3, kind: input, shape index: {}]   ;;  %s643_s4 = inlined_call_operand.vmem [shape: f32[128,128], index: 4, kind: output, shape index: {}]  }
   0x1 LB: > { %s477_s16 = sadd.s32 4294967295, %s566_s15   ;;  %p481_p0 = scmp.ge.s32.totalorder %s566_s15, 1  ;;  %s566_s15 = sphi %s593_s15, %s14_s15  }
   0x2   : > { %p174_p1 = scmp.lt.s32.totalorder %s566_s15, 3 }
   0x4   : > { %p175_p2 = pnand %p481_p0, %p174_p1 }
   0x5   : > { %v551_v0 = vld [vmem:[%s640_s1] sm:$0xff] (!%p175_p2)   ;;  %v552_v1 = vld [vmem:[%s640_s1 + $0x8] sm:$0xff] (!%p175_p2)   ;;  %s482_s21 = sshll.u32 (!%p175_p2), %s477_s16, 3  ;;  %v553_v2 = vld [vmem:[%s640_s1 + $0x10] sm:$0xff] (!%p175_p2)   ;;  %vm295_vm0 = vcmask (!%p175_p2), 588800   ;;  %vm308_vm1 = vcmask (!%p175_p2), 1043456  }
   0x6   : > { %178 = sbr.rel (%p175_p2) target bundleno = 248 (0xf8), region = 36  ;;  %513 = vmatprep.subr.bf16.mxu0 (!%p175_p2), %v551_v0  ;;  %531 = vmatprep.subr.bf16.mxu1 (!%p175_p2), %v551_v0  ;;  %p206_p3 = scmp.lt.s32.totalorder (!%p175_p2), %s482_s21, 15  ;;  %v554_v3 = vld [vmem:[%s640_s1 + $0x18] sm:$0xff] (!%p175_p2)   ;;  %v555_v6 = vld [vmem:[%s640_s1 + $0x20] ss:$0 sps:$4 sm:$0xff] (!%p175_p2)  }
   0x7   : > { %514 = vmatpush3.bf16.msra.mxu0 (!%p175_p2), %v551_v0  ;;  %536 = vmatpush3.bf16.msra.mxu1 (!%p175_p2), %v551_v0  ;;  %v310_v7 = vsel (!%p175_p2), %vm308_vm1, %v555_v6, 0  ;;  %v488_v10 = vld [vmem:[%s641_s2] ss:$0 sm:$0xff] (!%p175_p2) }
   0x8   : > { %515 = vmatprep.subr.bf16.mxu0 (!%p175_p2), %v552_v1  ;;  %532 = vmatprep.subr.bf16.mxu1 (!%p175_p2), %v552_v1 }
   0xb   : > { %516 = vmatpush3.bf16.msra.mxu0 (!%p175_p2), %v552_v1  ;;  %537 = vmatpush3.bf16.msra.mxu1 (!%p175_p2), %v552_v1 }
   0xc   : > { %517 = vmatprep.subr.bf16.mxu0 (!%p175_p2), %v553_v2  ;;  %533 = vmatprep.subr.bf16.mxu1 (!%p175_p2), %v553_v2 }
   0xd   : > { %s645_s21 = smov (!%p206_p3, %s482_s21), 15 }
   0xe   : > { %s483_s24 = sshll.u32 %s645_s21, 2  ;;  %s485_s6 = sshll.u32 %s645_s21, 3 }
   0xf   : > { %s209_s29 = scalar_lea.vmem %s639_s0, %s483_s24  ;;  %518 = vmatpush3.bf16.msra.mxu0 %v553_v2  ;;  %538 = vmatpush3.bf16.msra.mxu1 %v553_v2  ;;  %s215_s9 = scalar_lea.vmem %s642_s3, %s485_s6 }
  0x10   : > { %v556_v4 = vld [vmem:[%s209_s29] sm:$0xff]   ;;  %v557_v5 = vld [vmem:[%s209_s29 + $0x10] sm:$0xff]   ;;  %519 = vmatprep.subr.bf16.mxu0 %v554_v3  ;;  %534 = vmatprep.subr.bf16.mxu1 %v554_v3  ;;  %v558_v8 = vld [vmem:[%s209_s29 + $0x8] sm:$0xff]   ;;  %s221_s14 = scalar_lea.vmem %s643_s4, %s485_s6 }
  0x11   : > { %523 = vmatprep.mubr.msk.bf16.mxu0 %vm295_vm0, %v556_v4  ;;  %527 = vmatprep.mubr.msk.bf16.mxu1 %vm295_vm0, %v557_v5  ;;  %v559_v9 = vld [vmem:[%s209_s29 + $0x18] sm:$0xff]   ;;  %v379_v12 = vld [vmem:[%s215_s9 + $0x10] sm:$0xff]  ;;  %v377_v18 = vld [vmem:[%s215_s9] sm:$0xff] }
  0x12   : > { %v383_v14 = vld [vmem:[%s215_s9 + $0x30] sm:$0xff]  ;;  %v381_v20 = vld [vmem:[%s215_s9 + $0x20] sm:$0xff]  ;;  %v380_v24 = vld [vmem:[%s215_s9 + $0x18] sm:$0xff] }
  0x13   : > { %520 = vmatpush3.bf16.msra.mxu0 %v554_v3  ;;  %539 = vmatpush3.bf16.msra.mxu1 %v554_v3  ;;  %v384_v26 = vld [vmem:[%s215_s9 + $0x38] sm:$0xff]  ;;  %v378_v32 = vld [vmem:[%s215_s9 + $0x8] sm:$0xff] }
  0x14   : > { %541 = vmatprep.subr.msk.bf16.mxu0 %vm308_vm1, %v555_v6  ;;  %542 = vmatprep.subr.msk.bf16.mxu1 %vm308_vm1, %v555_v6  ;;  %v382_v34 = vld [vmem:[%s215_s9 + $0x28] sm:$0xff] }
  0x17   : > { %522 = vmatpush3.bf16.msra.mxu0 %v310_v7  ;;  %540 = vmatpush3.bf16.msra.mxu1 %v310_v7 }
  0x1a   : > { %524 = vmatmul.mubr.msk.bf16.vlgmr.msra.gmra.mrb[0].mxu0 %vm295_vm0, %v558_v8  ;;  %528 = vmatmul.mubr.msk.bf16.vlgmr.msra.gmra.mrb[0].mxu1 %vm295_vm0, %v559_v9 }
  0xed   : > { %v525_v11 = vpop.f32.mrb[0].mxu0  ;;  %v529_v13 = vpop.f32.mrb[0].mxu1 }
  0xee   : > { %v355_v15 = vadd.f32 %v525_v11, %v488_v10  ;;  %v371_v16 = vadd.f32 %v529_v13, %v488_v10  ;;  %v346_v17 = vpop.f32.mrb[1].mxu0  ;;  %v362_v19 = vpop.f32.mrb[1].mxu1 }
  0xef   : > { %v347_v21 = vadd.f32 %v488_v10, %v346_v17  ;;  %v363_v22 = vadd.f32 %v488_v10, %v362_v19  ;;  %v526_v23 = vpop.f32.mrb[2].mxu0  ;;  %v530_v25 = vpop.f32.mrb[2].mxu1 }
  0xf0   : > { %v387_v27 = vadd.f32 %v379_v12, %v355_v15  ;;  %v391_v28 = vadd.f32 %v383_v14, %v371_v16  ;;  %v358_v29 = vadd.f32 %v526_v23, %v488_v10  ;;  %v374_v30 = vadd.f32 %v530_v25, %v488_v10  ;;  %v349_v31 = vpop.f32.mrb[3].mxu0  ;;  %v365_v33 = vpop.f32.mrb[3].mxu1 }
  0xf1   : > { %v385_v35 = vadd.f32 %v377_v18, %v347_v21  ;;  %v389_v36 = vadd.f32 %v381_v20, %v363_v22  ;;  %v350_v37 = vadd.f32 %v488_v10, %v349_v31  ;;  %v366_v38 = vadd.f32 %v488_v10, %v365_v33 }
  0xf2   : > { %v395_v39 = vmax.f32 %v387_v27, 0.0  ;;  %v399_v40 = vmax.f32 %v391_v28, 0.0  ;;  %v388_v41 = vadd.f32 %v380_v24, %v358_v29  ;;  %v392_v42 = vadd.f32 %v384_v26, %v374_v30 }
  0xf3   : > { %v393_v43 = vmax.f32 %v385_v35, 0.0  ;;  %v397_v44 = vmax.f32 %v389_v36, 0.0  ;;  %v386_v45 = vadd.f32 %v378_v32, %v350_v37  ;;  %v390_v46 = vadd.f32 %v382_v34, %v366_v38 }
  0xf4   : > { %403 = vst [vmem:[%s221_s14 + $0x10] sm:$0xff] %v395_v39  ;;  %407 = vst [vmem:[%s221_s14 + $0x30] sm:$0xff] %v399_v40  ;;  %v396_v47 = vmax.f32 %v388_v41, 0.0  ;;  %v400_v48 = vmax.f32 %v392_v42, 0.0 }
  0xf5   : > { %401 = vst [vmem:[%s221_s14] sm:$0xff] %v393_v43  ;;  %405 = vst [vmem:[%s221_s14 + $0x20] sm:$0xff] %v397_v44  ;;  %v394_v49 = vmax.f32 %v386_v45, 0.0  ;;  %v398_v50 = vmax.f32 %v390_v46, 0.0 }
  0xf6   : > { %404 = vst [vmem:[%s221_s14 + $0x18] sm:$0xff] %v396_v47  ;;  %408 = vst [vmem:[%s221_s14 + $0x38] sm:$0xff] %v400_v48 }
  0xf7   : > { %402 = vst [vmem:[%s221_s14 + $0x8] sm:$0xff] %v394_v49  ;;  %406 = vst [vmem:[%s221_s14 + $0x28] sm:$0xff] %v398_v50 }
  0xf8 PF: > { %s14_s15 = sadd.s32 1, %s566_s15  }
  0xf9   : > { %p11_p4 = scmp.ge.s32.totalorder %s14_s15, 4  }
  0xfb   :  { %13 = sbr.rel (!%p11_p4) target bundleno = 1 (0x1), region = 69 }

</bundles_post_ra>
